<compile_context>
chip_gen: v7x
topology: tpu7x:2x2x1
jax: 0.10.0
libtpu: 0.0.40
codegen_flags: <defaults>
</compile_context>

<pallas_src>
import functools

import jax
import jax.numpy as jnp
from jax.experimental import pallas as pl
from jax.experimental.pallas import tpu as pltpu


def _lstm_recurrent_kernel(hidden_size, seq_len,
                           xproj_ref, whh_ref, h0_ref, c0_ref,
                           hseq_ref, hN_ref, cN_ref):
    """Whole sequence in one kernel invocation; PyTorch gate order (i, f, g, o)."""
    H = hidden_size

    def step(t, carry):
        h, c = carry
        # gates = X_proj[t] + h @ W_hh^T      (biases already folded into X_proj)
        gates = xproj_ref[t] + jnp.dot(h, whh_ref[...],
                                       preferred_element_type=jnp.float32)
        i_g = jax.nn.sigmoid(gates[:, 0:H])
        f_g = jax.nn.sigmoid(gates[:, H:2 * H])
        g_g = jnp.tanh(gates[:, 2 * H:3 * H])
        o_g = jax.nn.sigmoid(gates[:, 3 * H:4 * H])

        c_new = f_g * c + i_g * g_g
        h_new = o_g * jnp.tanh(c_new)

        hseq_ref[t] = h_new          # store this timestep's hidden state
        return (h_new, c_new)

    h_last, c_last = jax.lax.fori_loop(
        0, seq_len, step, (h0_ref[0], c0_ref[0]), unroll=True)

    # Final state written exactly once.
    hN_ref[0] = h_last
    cN_ref[0] = c_last


def _linear_kernel(h_ref, wlin_ref, blin_ref, out_ref):
    """out = H_flat @ W_lin^T + b_lin  — one batched MXU matmul over all T*B rows."""
    out_ref[...] = (jnp.dot(h_ref[...], wlin_ref[...],
                            preferred_element_type=jnp.float32)
                    + blin_ref[...])


@functools.partial(jax.jit, static_argnames=("vocab_size", "hidden_size"))
def lstm_model_forward(inputs, state, params, vocab_size, hidden_size):
    """Mirrors LSTMModel.forward: returns (output, (h_n, c_n))."""
    h0, c0 = state                                     # each (1, B, H)
    B, T = inputs.shape
    V, H = vocab_size, hidden_size

    # --- Glue (wrapper-side, outside the sequential loop) ---------------------
    # one_hot(x) @ W_ih^T  ==  W_ih^T[x]  (embedding gather), biases folded in.
    wih_rows = params["w_ih"].T                        # (V, 4H)
    bias = (params["b_ih"] + params["b_hh"]).reshape(1, 1, 4 * H)
    X_proj = jnp.take(wih_rows, inputs.T, axis=0) + bias          # (T, B, 4H)

    whh_t = params["w_hh"].T                           # (H, 4H)
    wlin_t = params["w_lin"].T                         # (H, V)
    blin = params["b_lin"].reshape(1, V)

    vmem = pl.BlockSpec(memory_space=pltpu.MemorySpace.VMEM)

    # --- Kernel 1: the sequential recurrence (single invocation, no grid) -----
    h_seq, h_n, c_n = pl.pallas_call(
        functools.partial(_lstm_recurrent_kernel, H, T),
        out_shape=(
            jax.ShapeDtypeStruct((T, B, H), jnp.float32),
            jax.ShapeDtypeStruct((1, B, H), jnp.float32),
            jax.ShapeDtypeStruct((1, B, H), jnp.float32),
        ),
        in_specs=[vmem, vmem, vmem, vmem],
        out_specs=(vmem, vmem, vmem),
    )(X_proj, whh_t, h0, c0)

    # --- Kernel 2: batched output projection (parallel, outside recurrence) ---
    h_flat = h_seq.reshape(T * B, H)                   # matches Y.reshape(-1, H)
    output = pl.pallas_call(
        _linear_kernel,
        out_shape=jax.ShapeDtypeStruct((T * B, V), jnp.float32),
        in_specs=[vmem, vmem, vmem],
        out_specs=vmem,
    )(h_flat, wlin_t, blin)

    return output, (h_n, c_n)


def _reference_forward(inputs, state, params, vocab_size, hidden_size):
    """Pure-JAX reference matching PyTorch nn.LSTM + nn.Linear semantics."""
    h, c = state[0][0], state[1][0]
    X = jax.nn.one_hot(inputs.T, vocab_size, dtype=jnp.float32)
    H = hidden_size

    def step(carry, x_t):
        h, c = carry
        gates = (x_t @ params["w_ih"].T + params["b_ih"]
                 + h @ params["w_hh"].T + params["b_hh"])
        i = jax.nn.sigmoid(gates[:, 0:H])
        f = jax.nn.sigmoid(gates[:, H:2 * H])
        g = jnp.tanh(gates[:, 2 * H:3 * H])
        o = jax.nn.sigmoid(gates[:, 3 * H:4 * H])
        c = f * c + i * g
        h = o * jnp.tanh(c)
        return (h, c), h

    (h, c), ys = jax.lax.scan(step, (h, c), X)
    out = ys.reshape(-1, H) @ params["w_lin"].T + params["b_lin"]
    return out, (h[None], c[None])


def init_params(key, vocab_size, hidden_size):
    """Deterministic parameter init (PyTorch LSTM/Linear shapes, uniform(-k, k))."""
    V, H = vocab_size, hidden_size
    k = 1.0 / jnp.sqrt(jnp.float32(H))
    ks = jax.random.split(key, 6)
    u = lambda kk, shape: jax.random.uniform(kk, shape, jnp.float32, -k, k)
    return {
        "w_ih": u(ks[0], (4 * H, V)),
        "w_hh": u(ks[1], (4 * H, H)),
        "b_ih": u(ks[2], (4 * H,)),
        "b_hh": u(ks[3], (4 * H,)),
        "w_lin": u(ks[4], (V, H)),
        "b_lin": u(ks[5], (V,)),
    }


if __name__ == "__main__":
    VOCAB = 32
    HIDDEN = 32
    BATCH = 2
    SEQ = 8

    key = jax.random.PRNGKey(0)
    k_inp, k_par = jax.random.split(key)

    inputs = jax.random.randint(k_inp, (BATCH, SEQ), 0, VOCAB, dtype=jnp.int32)
    params = init_params(k_par, VOCAB, HIDDEN)

    # begin_state(batch_size=BATCH) for unidirectional, single-layer LSTM
    state = (jnp.zeros((1, BATCH, HIDDEN), jnp.float32),
             jnp.zeros((1, BATCH, HIDDEN), jnp.float32))

    out, (h_n, c_n) = lstm_model_forward(inputs, state, params, VOCAB, HIDDEN)
    jax.block_until_ready((out, h_n, c_n))

    ref_out, (ref_h, ref_c) = _reference_forward(inputs, state, params, VOCAB, HIDDEN)
    assert out.shape == (SEQ * BATCH, VOCAB)
    assert h_n.shape == (1, BATCH, HIDDEN) and c_n.shape == (1, BATCH, HIDDEN)
    assert jnp.allclose(out, ref_out, atol=1e-5, rtol=1e-5)
    assert jnp.allclose(h_n, ref_h, atol=1e-5, rtol=1e-5)
    assert jnp.allclose(c_n, ref_c, atol=1e-5, rtol=1e-5)

    print("KERNEL_OK")
</pallas_src>

<mosaic_0001>
module attributes {stable_mosaic.version = 11 : i64} {
  func.func @_linear_kernel(%arg0: memref<16x32xf32, #tpu.memory_space<vmem>>, %arg1: memref<32x32xf32, #tpu.memory_space<vmem>>, %arg2: memref<1x32xf32, #tpu.memory_space<vmem>>, %arg3: memref<16x32xf32, #tpu.memory_space<vmem>>) attributes {dimension_semantics = [], scalar_prefetch = 0 : i64, scratch_operands = 0 : i64, tpu.core_type = #tpu.core_type<tc>} {
    %c0 = arith.constant 0 : index
    %c0_0 = arith.constant 0 : index
    %0 = vector.load %arg0[%c0, %c0_0] : memref<16x32xf32, #tpu.memory_space<vmem>>, vector<16x32xf32>
    %c0_1 = arith.constant 0 : index
    %c0_2 = arith.constant 0 : index
    %1 = vector.load %arg1[%c0_1, %c0_2] : memref<32x32xf32, #tpu.memory_space<vmem>>, vector<32x32xf32>
    %cst = arith.constant dense<0.000000e+00> : vector<16x32xf32>
    %2 = tpu.matmul %0, %1, %cst {dimension_numbers = #tpu.dot_dimension_numbers<[1], [0], [0], [1], [0, 0, 1, 1], [], []>} : vector<16x32xf32>, vector<32x32xf32>, vector<16x32xf32> -> vector<16x32xf32>
    %c0_3 = arith.constant 0 : index
    %c0_4 = arith.constant 0 : index
    %3 = vector.load %arg2[%c0_3, %c0_4] : memref<1x32xf32, #tpu.memory_space<vmem>>, vector<1x32xf32>
    %4 = vector.broadcast %3 : vector<1x32xf32> to vector<16x32xf32>
    %5 = arith.addf %2, %4 : vector<16x32xf32>
    %c0_5 = arith.constant 0 : index
    %c0_6 = arith.constant 0 : index
    %6 = vector.load %arg3[%c0_5, %c0_6] : memref<16x32xf32, #tpu.memory_space<vmem>>, vector<16x32xf32>
    tpu.vector_store %arg3[%c0_5, %c0_6], %5 {strides = array<i32>} : memref<16x32xf32, #tpu.memory_space<vmem>>, vector<16x32xf32>,
    return
  }
}

module attributes {stable_mosaic.version = 11 : i64} {
  func.func @_lstm_recurrent_kernel(%arg0: memref<8x2x128xf32, #tpu.memory_space<vmem>>, %arg1: memref<32x128xf32, #tpu.memory_space<vmem>>, %arg2: memref<1x2x32xf32, #tpu.memory_space<vmem>>, %arg3: memref<1x2x32xf32, #tpu.memory_space<vmem>>, %arg4: memref<8x2x32xf32, #tpu.memory_space<vmem>>, %arg5: memref<1x2x32xf32, #tpu.memory_space<vmem>>, %arg6: memref<1x2x32xf32, #tpu.memory_space<vmem>>) attributes {dimension_semantics = [], scalar_prefetch = 0 : i64, scratch_operands = 0 : i64, tpu.core_type = #tpu.core_type<tc>} {
    %c0 = arith.constant 0 : index
    %c0_0 = arith.constant 0 : index
    %c0_1 = arith.constant 0 : index
    %0 = vector.load %arg2[%c0, %c0_0, %c0_1] : memref<1x2x32xf32, #tpu.memory_space<vmem>>, vector<1x2x32xf32>
    %1 = vector.shape_cast %0 : vector<1x2x32xf32> to vector<2x32xf32>
    %c0_2 = arith.constant 0 : index
    %c0_3 = arith.constant 0 : index
    %c0_4 = arith.constant 0 : index
    %2 = vector.load %arg3[%c0_2, %c0_3, %c0_4] : memref<1x2x32xf32, #tpu.memory_space<vmem>>, vector<1x2x32xf32>
    %3 = vector.shape_cast %2 : vector<1x2x32xf32> to vector<2x32xf32>
    %c0_i32 = arith.constant 0 : i32
    %4 = arith.index_cast %c0_i32 : i32 to index
    %c0_5 = arith.constant 0 : index
    %c0_6 = arith.constant 0 : index
    %5 = vector.load %arg0[%4, %c0_5, %c0_6] : memref<8x2x128xf32, #tpu.memory_space<vmem>>, vector<1x2x128xf32>
    %6 = vector.shape_cast %5 : vector<1x2x128xf32> to vector<2x128xf32>
    %c0_7 = arith.constant 0 : index
    %c0_8 = arith.constant 0 : index
    %7 = vector.load %arg1[%c0_7, %c0_8] : memref<32x128xf32, #tpu.memory_space<vmem>>, vector<32x128xf32>
    %cst = arith.constant dense<0.000000e+00> : vector<2x128xf32>
    %8 = tpu.matmul %1, %7, %cst {dimension_numbers = #tpu.dot_dimension_numbers<[1], [0], [0], [1], [0, 0, 1, 1], [], []>} : vector<2x32xf32>, vector<32x128xf32>, vector<2x128xf32> -> vector<2x128xf32>
    %9 = arith.addf %6, %8 : vector<2x128xf32>
    %10 = vector.extract_strided_slice %9 {offsets = [0, 0], sizes = [2, 32], strides = [1, 1]} : vector<2x128xf32> to vector<2x32xf32>
    %11 = arith.negf %10 : vector<2x32xf32>
    %12 = math.exp %11 : vector<2x32xf32>
    %cst_9 = arith.constant 1.000000e+00 : f32
    %13 = vector.broadcast %cst_9 : f32 to vector<2x32xf32>
    %14 = arith.addf %13, %12 : vector<2x32xf32>
    %15 = arith.divf %13, %14 : vector<2x32xf32>
    %16 = vector.extract_strided_slice %9 {offsets = [0, 32], sizes = [2, 32], strides = [1, 1]} : vector<2x128xf32> to vector<2x32xf32>
    %17 = arith.negf %16 : vector<2x32xf32>
    %18 = math.exp %17 : vector<2x32xf32>
    %cst_10 = arith.constant 1.000000e+00 : f32
    %19 = vector.broadcast %cst_10 : f32 to vector<2x32xf32>
    %20 = arith.addf %19, %18 : vector<2x32xf32>
    %21 = arith.divf %19, %20 : vector<2x32xf32>
    %22 = vector.extract_strided_slice %9 {offsets = [0, 64], sizes = [2, 32], strides = [1, 1]} : vector<2x128xf32> to vector<2x32xf32>
    %23 = math.tanh %22 : vector<2x32xf32>
    %24 = vector.extract_strided_slice %9 {offsets = [0, 96], sizes = [2, 32], strides = [1, 1]} : vector<2x128xf32> to vector<2x32xf32>
    %25 = arith.negf %24 : vector<2x32xf32>
    %26 = math.exp %25 : vector<2x32xf32>
    %cst_11 = arith.constant 1.000000e+00 : f32
    %27 = vector.broadcast %cst_11 : f32 to vector<2x32xf32>
    %28 = arith.addf %27, %26 : vector<2x32xf32>
    %29 = arith.divf %27, %28 : vector<2x32xf32>
    %30 = arith.mulf %21, %3 : vector<2x32xf32>
    %31 = arith.mulf %15, %23 : vector<2x32xf32>
    %32 = arith.addf %30, %31 : vector<2x32xf32>
    %33 = math.tanh %32 : vector<2x32xf32>
    %34 = arith.mulf %29, %33 : vector<2x32xf32>
    %35 = arith.index_cast %c0_i32 : i32 to index
    %c0_12 = arith.constant 0 : index
    %c0_13 = arith.constant 0 : index
    %36 = vector.load %arg4[%35, %c0_12, %c0_13] : memref<8x2x32xf32, #tpu.memory_space<vmem>>, vector<1x2x32xf32>
    %37 = vector.shape_cast %36 : vector<1x2x32xf32> to vector<2x32xf32>
    %38 = vector.shape_cast %34 : vector<2x32xf32> to vector<1x2x32xf32>
    tpu.vector_store %arg4[%35, %c0_12, %c0_13], %38 {strides = array<i32>} : memref<8x2x32xf32, #tpu.memory_space<vmem>>, vector<1x2x32xf32>,
    %c1_i32 = arith.constant 1 : i32
    %39 = arith.index_cast %c1_i32 : i32 to index
    %c0_14 = arith.constant 0 : index
    %c0_15 = arith.constant 0 : index
    %40 = vector.load %arg0[%39, %c0_14, %c0_15] : memref<8x2x128xf32, #tpu.memory_space<vmem>>, vector<1x2x128xf32>
    %41 = vector.shape_cast %40 : vector<1x2x128xf32> to vector<2x128xf32>
    %c0_16 = arith.constant 0 : index
    %c0_17 = arith.constant 0 : index
    %42 = vector.load %arg1[%c0_16, %c0_17] : memref<32x128xf32, #tpu.memory_space<vmem>>, vector<32x128xf32>
    %cst_18 = arith.constant dense<0.000000e+00> : vector<2x128xf32>
    %43 = tpu.matmul %34, %42, %cst_18 {dimension_numbers = #tpu.dot_dimension_numbers<[1], [0], [0], [1], [0, 0, 1, 1], [], []>} : vector<2x32xf32>, vector<32x128xf32>, vector<2x128xf32> -> vector<2x128xf32>
    %44 = arith.addf %41, %43 : vector<2x128xf32>
    %45 = vector.extract_strided_slice %44 {offsets = [0, 0], sizes = [2, 32], strides = [1, 1]} : vector<2x128xf32> to vector<2x32xf32>
    %46 = arith.negf %45 : vector<2x32xf32>
    %47 = math.exp %46 : vector<2x32xf32>
    %cst_19 = arith.constant 1.000000e+00 : f32
    %48 = vector.broadcast %cst_19 : f32 to vector<2x32xf32>
    %49 = arith.addf %48, %47 : vector<2x32xf32>
    %50 = arith.divf %48, %49 : vector<2x32xf32>
    %51 = vector.extract_strided_slice %44 {offsets = [0, 32], sizes = [2, 32], strides = [1, 1]} : vector<2x128xf32> to vector<2x32xf32>
    %52 = arith.negf %51 : vector<2x32xf32>
    %53 = math.exp %52 : vector<2x32xf32>
    %cst_20 = arith.constant 1.000000e+00 : f32
    %54 = vector.broadcast %cst_20 : f32 to vector<2x32xf32>
    %55 = arith.addf %54, %53 : vector<2x32xf32>
    %56 = arith.divf %54, %55 : vector<2x32xf32>
    %57 = vector.extract_strided_slice %44 {offsets = [0, 64], sizes = [2, 32], strides = [1, 1]} : vector<2x128xf32> to vector<2x32xf32>
    %58 = math.tanh %57 : vector<2x32xf32>
    %59 = vector.extract_strided_slice %44 {offsets = [0, 96], sizes = [2, 32], strides = [1, 1]} : vector<2x128xf32> to vector<2x32xf32>
    %60 = arith.negf %59 : vector<2x32xf32>
    %61 = math.exp %60 : vector<2x32xf32>
    %cst_21 = arith.constant 1.000000e+00 : f32
    %62 = vector.broadcast %cst_21 : f32 to vector<2x32xf32>
    %63 = arith.addf %62, %61 : vector<2x32xf32>
    %64 = arith.divf %62, %63 : vector<2x32xf32>
    %65 = arith.mulf %56, %32 : vector<2x32xf32>
    %66 = arith.mulf %50, %58 : vector<2x32xf32>
    %67 = arith.addf %65, %66 : vector<2x32xf32>
    %68 = math.tanh %67 : vector<2x32xf32>
    %69 = arith.mulf %64, %68 : vector<2x32xf32>
    %70 = arith.index_cast %c1_i32 : i32 to index
    %c0_22 = arith.constant 0 : index
    %c0_23 = arith.constant 0 : index
    %71 = vector.load %arg4[%70, %c0_22, %c0_23] : memref<8x2x32xf32, #tpu.memory_space<vmem>>, vector<1x2x32xf32>
    %72 = vector.shape_cast %71 : vector<1x2x32xf32> to vector<2x32xf32>
    %73 = vector.shape_cast %69 : vector<2x32xf32> to vector<1x2x32xf32>
    tpu.vector_store %arg4[%70, %c0_22, %c0_23], %73 {strides = array<i32>} : memref<8x2x32xf32, #tpu.memory_space<vmem>>, vector<1x2x32xf32>,
    %c2_i32 = arith.constant 2 : i32
    %74 = arith.index_cast %c2_i32 : i32 to index
    %c0_24 = arith.constant 0 : index
    %c0_25 = arith.constant 0 : index
    %75 = vector.load %arg0[%74, %c0_24, %c0_25] : memref<8x2x128xf32, #tpu.memory_space<vmem>>, vector<1x2x128xf32>
    %76 = vector.shape_cast %75 : vector<1x2x128xf32> to vector<2x128xf32>
    %c0_26 = arith.constant 0 : index
    %c0_27 = arith.constant 0 : index
    %77 = vector.load %arg1[%c0_26, %c0_27] : memref<32x128xf32, #tpu.memory_space<vmem>>, vector<32x128xf32>
    %cst_28 = arith.constant dense<0.000000e+00> : vector<2x128xf32>
    %78 = tpu.matmul %69, %77, %cst_28 {dimension_numbers = #tpu.dot_dimension_numbers<[1], [0], [0], [1], [0, 0, 1, 1], [], []>} : vector<2x32xf32>, vector<32x128xf32>, vector<2x128xf32> -> vector<2x128xf32>
    %79 = arith.addf %76, %78 : vector<2x128xf32>
    %80 = vector.extract_strided_slice %79 {offsets = [0, 0], sizes = [2, 32], strides = [1, 1]} : vector<2x128xf32> to vector<2x32xf32>
    %81 = arith.negf %80 : vector<2x32xf32>
    %82 = math.exp %81 : vector<2x32xf32>
    %cst_29 = arith.constant 1.000000e+00 : f32
    %83 = vector.broadcast %cst_29 : f32 to vector<2x32xf32>
    %84 = arith.addf %83, %82 : vector<2x32xf32>
    %85 = arith.divf %83, %84 : vector<2x32xf32>
    %86 = vector.extract_strided_slice %79 {offsets = [0, 32], sizes = [2, 32], strides = [1, 1]} : vector<2x128xf32> to vector<2x32xf32>
    %87 = arith.negf %86 : vector<2x32xf32>
    %88 = math.exp %87 : vector<2x32xf32>
    %cst_30 = arith.constant 1.000000e+00 : f32
    %89 = vector.broadcast %cst_30 : f32 to vector<2x32xf32>
    %90 = arith.addf %89, %88 : vector<2x32xf32>
    %91 = arith.divf %89, %90 : vector<2x32xf32>
    %92 = vector.extract_strided_slice %79 {offsets = [0, 64], sizes = [2, 32], strides = [1, 1]} : vector<2x128xf32> to vector<2x32xf32>
    %93 = math.tanh %92 : vector<2x32xf32>
    %94 = vector.extract_strided_slice %79 {offsets = [0, 96], sizes = [2, 32], strides = [1, 1]} : vector<2x128xf32> to vector<2x32xf32>
    %95 = arith.negf %94 : vector<2x32xf32>
    %96 = math.exp %95 : vector<2x32xf32>
    %cst_31 = arith.constant 1.000000e+00 : f32
    %97 = vector.broadcast %cst_31 : f32 to vector<2x32xf32>
    %98 = arith.addf %97, %96 : vector<2x32xf32>
    %99 = arith.divf %97, %98 : vector<2x32xf32>
    %100 = arith.mulf %91, %67 : vector<2x32xf32>
    %101 = arith.mulf %85, %93 : vector<2x32xf32>
    %102 = arith.addf %100, %101 : vector<2x32xf32>
    %103 = math.tanh %102 : vector<2x32xf32>
    %104 = arith.mulf %99, %103 : vector<2x32xf32>
    %105 = arith.index_cast %c2_i32 : i32 to index
    %c0_32 = arith.constant 0 : index
    %c0_33 = arith.constant 0 : index
    %106 = vector.load %arg4[%105, %c0_32, %c0_33] : memref<8x2x32xf32, #tpu.memory_space<vmem>>, vector<1x2x32xf32>
    %107 = vector.shape_cast %106 : vector<1x2x32xf32> to vector<2x32xf32>
    %108 = vector.shape_cast %104 : vector<2x32xf32> to vector<1x2x32xf32>
    tpu.vector_store %arg4[%105, %c0_32, %c0_33], %108 {strides = array<i32>} : memref<8x2x32xf32, #tpu.memory_space<vmem>>, vector<1x2x32xf32>,
    %c3_i32 = arith.constant 3 : i32
    %109 = arith.index_cast %c3_i32 : i32 to index
    %c0_34 = arith.constant 0 : index
    %c0_35 = arith.constant 0 : index
    %110 = vector.load %arg0[%109, %c0_34, %c0_35] : memref<8x2x128xf32, #tpu.memory_space<vmem>>, vector<1x2x128xf32>
    %111 = vector.shape_cast %110 : vector<1x2x128xf32> to vector<2x128xf32>
    %c0_36 = arith.constant 0 : index
    %c0_37 = arith.constant 0 : index
    %112 = vector.load %arg1[%c0_36, %c0_37] : memref<32x128xf32, #tpu.memory_space<vmem>>, vector<32x128xf32>
    %cst_38 = arith.constant dense<0.000000e+00> : vector<2x128xf32>
    %113 = tpu.matmul %104, %112, %cst_38 {dimension_numbers = #tpu.dot_dimension_numbers<[1], [0], [0], [1], [0, 0, 1, 1], [], []>} : vector<2x32xf32>, vector<32x128xf32>, vector<2x128xf32> -> vector<2x128xf32>
    %114 = arith.addf %111, %113 : vector<2x128xf32>
    %115 = vector.extract_strided_slice %114 {offsets = [0, 0], sizes = [2, 32], strides = [1, 1]} : vector<2x128xf32> to vector<2x32xf32>
    %116 = arith.negf %115 : vector<2x32xf32>
    %117 = math.exp %116 : vector<2x32xf32>
    %cst_39 = arith.constant 1.000000e+00 : f32
    %118 = vector.broadcast %cst_39 : f32 to vector<2x32xf32>
    %119 = arith.addf %118, %117 : vector<2x32xf32>
    %120 = arith.divf %118, %119 : vector<2x32xf32>
    %121 = vector.extract_strided_slice %114 {offsets = [0, 32], sizes = [2, 32], strides = [1, 1]} : vector<2x128xf32> to vector<2x32xf32>
    %122 = arith.negf %121 : vector<2x32xf32>
    %123 = math.exp %122 : vector<2x32xf32>
    %cst_40 = arith.constant 1.000000e+00 : f32
    %124 = vector.broadcast %cst_40 : f32 to vector<2x32xf32>
    %125 = arith.addf %124, %123 : vector<2x32xf32>
    %126 = arith.divf %124, %125 : vector<2x32xf32>
    %127 = vector.extract_strided_slice %114 {offsets = [0, 64], sizes = [2, 32], strides = [1, 1]} : vector<2x128xf32> to vector<2x32xf32>
    %128 = math.tanh %127 : vector<2x32xf32>
    %129 = vector.extract_strided_slice %114 {offsets = [0, 96], sizes = [2, 32], strides = [1, 1]} : vector<2x128xf32> to vector<2x32xf32>
    %130 = arith.negf %129 : vector<2x32xf32>
    %131 = math.exp %130 : vector<2x32xf32>
    %cst_41 = arith.constant 1.000000e+00 : f32
    %132 = vector.broadcast %cst_41 : f32 to vector<2x32xf32>
    %133 = arith.addf %132, %131 : vector<2x32xf32>
    %134 = arith.divf %132, %133 : vector<2x32xf32>
    %135 = arith.mulf %126, %102 : vector<2x32xf32>
    %136 = arith.mulf %120, %128 : vector<2x32xf32>
    %137 = arith.addf %135, %136 : vector<2x32xf32>
    %138 = math.tanh %137 : vector<2x32xf32>
    %139 = arith.mulf %134, %138 : vector<2x32xf32>
    %140 = arith.index_cast %c3_i32 : i32 to index
    %c0_42 = arith.constant 0 : index
    %c0_43 = arith.constant 0 : index
    %141 = vector.load %arg4[%140, %c0_42, %c0_43] : memref<8x2x32xf32, #tpu.memory_space<vmem>>, vector<1x2x32xf32>
    %142 = vector.shape_cast %141 : vector<1x2x32xf32> to vector<2x32xf32>
    %143 = vector.shape_cast %139 : vector<2x32xf32> to vector<1x2x32xf32>
    tpu.vector_store %arg4[%140, %c0_42, %c0_43], %143 {strides = array<i32>} : memref<8x2x32xf32, #tpu.memory_space<vmem>>, vector<1x2x32xf32>,
    %c4_i32 = arith.constant 4 : i32
    %144 = arith.index_cast %c4_i32 : i32 to index
    %c0_44 = arith.constant 0 : index
    %c0_45 = arith.constant 0 : index
    %145 = vector.load %arg0[%144, %c0_44, %c0_45] : memref<8x2x128xf32, #tpu.memory_space<vmem>>, vector<1x2x128xf32>
    %146 = vector.shape_cast %145 : vector<1x2x128xf32> to vector<2x128xf32>
    %c0_46 = arith.constant 0 : index
    %c0_47 = arith.constant 0 : index
    %147 = vector.load %arg1[%c0_46, %c0_47] : memref<32x128xf32, #tpu.memory_space<vmem>>, vector<32x128xf32>
    %cst_48 = arith.constant dense<0.000000e+00> : vector<2x128xf32>
    %148 = tpu.matmul %139, %147, %cst_48 {dimension_numbers = #tpu.dot_dimension_numbers<[1], [0], [0], [1], [0, 0, 1, 1], [], []>} : vector<2x32xf32>, vector<32x128xf32>, vector<2x128xf32> -> vector<2x128xf32>
    %149 = arith.addf %146, %148 : vector<2x128xf32>
    %150 = vector.extract_strided_slice %149 {offsets = [0, 0], sizes = [2, 32], strides = [1, 1]} : vector<2x128xf32> to vector<2x32xf32>
    %151 = arith.negf %150 : vector<2x32xf32>
    %152 = math.exp %151 : vector<2x32xf32>
    %cst_49 = arith.constant 1.000000e+00 : f32
    %153 = vector.broadcast %cst_49 : f32 to vector<2x32xf32>
    %154 = arith.addf %153, %152 : vector<2x32xf32>
    %155 = arith.divf %153, %154 : vector<2x32xf32>
    %156 = vector.extract_strided_slice %149 {offsets = [0, 32], sizes = [2, 32], strides = [1, 1]} : vector<2x128xf32> to vector<2x32xf32>
    %157 = arith.negf %156 : vector<2x32xf32>
    %158 = math.exp %157 : vector<2x32xf32>
    %cst_50 = arith.constant 1.000000e+00 : f32
    %159 = vector.broadcast %cst_50 : f32 to vector<2x32xf32>
    %160 = arith.addf %159, %158 : vector<2x32xf32>
    %161 = arith.divf %159, %160 : vector<2x32xf32>
    %162 = vector.extract_strided_slice %149 {offsets = [0, 64], sizes = [2, 32], strides = [1, 1]} : vector<2x128xf32> to vector<2x32xf32>
    %163 = math.tanh %162 : vector<2x32xf32>
    %164 = vector.extract_strided_slice %149 {offsets = [0, 96], sizes = [2, 32], strides = [1, 1]} : vector<2x128xf32> to vector<2x32xf32>
    %165 = arith.negf %164 : vector<2x32xf32>
    %166 = math.exp %165 : vector<2x32xf32>
    %cst_51 = arith.constant 1.000000e+00 : f32
    %167 = vector.broadcast %cst_51 : f32 to vector<2x32xf32>
    %168 = arith.addf %167, %166 : vector<2x32xf32>
    %169 = arith.divf %167, %168 : vector<2x32xf32>
    %170 = arith.mulf %161, %137 : vector<2x32xf32>
    %171 = arith.mulf %155, %163 : vector<2x32xf32>
    %172 = arith.addf %170, %171 : vector<2x32xf32>
    %173 = math.tanh %172 : vector<2x32xf32>
    %174 = arith.mulf %169, %173 : vector<2x32xf32>
    %175 = arith.index_cast %c4_i32 : i32 to index
    %c0_52 = arith.constant 0 : index
    %c0_53 = arith.constant 0 : index
    %176 = vector.load %arg4[%175, %c0_52, %c0_53] : memref<8x2x32xf32, #tpu.memory_space<vmem>>, vector<1x2x32xf32>
    %177 = vector.shape_cast %176 : vector<1x2x32xf32> to vector<2x32xf32>
    %178 = vector.shape_cast %174 : vector<2x32xf32> to vector<1x2x32xf32>
    tpu.vector_store %arg4[%175, %c0_52, %c0_53], %178 {strides = array<i32>} : memref<8x2x32xf32, #tpu.memory_space<vmem>>, vector<1x2x32xf32>,
    %c5_i32 = arith.constant 5 : i32
    %179 = arith.index_cast %c5_i32 : i32 to index
    %c0_54 = arith.constant 0 : index
    %c0_55 = arith.constant 0 : index
    %180 = vector.load %arg0[%179, %c0_54, %c0_55] : memref<8x2x128xf32, #tpu.memory_space<vmem>>, vector<1x2x128xf32>
    %181 = vector.shape_cast %180 : vector<1x2x128xf32> to vector<2x128xf32>
    %c0_56 = arith.constant 0 : index
    %c0_57 = arith.constant 0 : index
    %182 = vector.load %arg1[%c0_56, %c0_57] : memref<32x128xf32, #tpu.memory_space<vmem>>, vector<32x128xf32>
    %cst_58 = arith.constant dense<0.000000e+00> : vector<2x128xf32>
    %183 = tpu.matmul %174, %182, %cst_58 {dimension_numbers = #tpu.dot_dimension_numbers<[1], [0], [0], [1], [0, 0, 1, 1], [], []>} : vector<2x32xf32>, vector<32x128xf32>, vector<2x128xf32> -> vector<2x128xf32>
    %184 = arith.addf %181, %183 : vector<2x128xf32>
    %185 = vector.extract_strided_slice %184 {offsets = [0, 0], sizes = [2, 32], strides = [1, 1]} : vector<2x128xf32> to vector<2x32xf32>
    %186 = arith.negf %185 : vector<2x32xf32>
    %187 = math.exp %186 : vector<2x32xf32>
    %cst_59 = arith.constant 1.000000e+00 : f32
    %188 = vector.broadcast %cst_59 : f32 to vector<2x32xf32>
    %189 = arith.addf %188, %187 : vector<2x32xf32>
    %190 = arith.divf %188, %189 : vector<2x32xf32>
    %191 = vector.extract_strided_slice %184 {offsets = [0, 32], sizes = [2, 32], strides = [1, 1]} : vector<2x128xf32> to vector<2x32xf32>
    %192 = arith.negf %191 : vector<2x32xf32>
    %193 = math.exp %192 : vector<2x32xf32>
    %cst_60 = arith.constant 1.000000e+00 : f32
    %194 = vector.broadcast %cst_60 : f32 to vector<2x32xf32>
    %195 = arith.addf %194, %193 : vector<2x32xf32>
    %196 = arith.divf %194, %195 : vector<2x32xf32>
    %197 = vector.extract_strided_slice %184 {offsets = [0, 64], sizes = [2, 32], strides = [1, 1]} : vector<2x128xf32> to vector<2x32xf32>
    %198 = math.tanh %197 : vector<2x32xf32>
    %199 = vector.extract_strided_slice %184 {offsets = [0, 96], sizes = [2, 32], strides = [1, 1]} : vector<2x128xf32> to vector<2x32xf32>
    %200 = arith.negf %199 : vector<2x32xf32>
    %201 = math.exp %200 : vector<2x32xf32>
    %cst_61 = arith.constant 1.000000e+00 : f32
    %202 = vector.broadcast %cst_61 : f32 to vector<2x32xf32>
    %203 = arith.addf %202, %201 : vector<2x32xf32>
    %204 = arith.divf %202, %203 : vector<2x32xf32>
    %205 = arith.mulf %196, %172 : vector<2x32xf32>
    %206 = arith.mulf %190, %198 : vector<2x32xf32>
    %207 = arith.addf %205, %206 : vector<2x32xf32>
    %208 = math.tanh %207 : vector<2x32xf32>
    %209 = arith.mulf %204, %208 : vector<2x32xf32>
    %210 = arith.index_cast %c5_i32 : i32 to index
    %c0_62 = arith.constant 0 : index
    %c0_63 = arith.constant 0 : index
    %211 = vector.load %arg4[%210, %c0_62, %c0_63] : memref<8x2x32xf32, #tpu.memory_space<vmem>>, vector<1x2x32xf32>
    %212 = vector.shape_cast %211 : vector<1x2x32xf32> to vector<2x32xf32>
    %213 = vector.shape_cast %209 : vector<2x32xf32> to vector<1x2x32xf32>
    tpu.vector_store %arg4[%210, %c0_62, %c0_63], %213 {strides = array<i32>} : memref<8x2x32xf32, #tpu.memory_space<vmem>>, vector<1x2x32xf32>,
    %c6_i32 = arith.constant 6 : i32
    %214 = arith.index_cast %c6_i32 : i32 to index
    %c0_64 = arith.constant 0 : index
    %c0_65 = arith.constant 0 : index
    %215 = vector.load %arg0[%214, %c0_64, %c0_65] : memref<8x2x128xf32, #tpu.memory_space<vmem>>, vector<1x2x128xf32>
    %216 = vector.shape_cast %215 : vector<1x2x128xf32> to vector<2x128xf32>
    %c0_66 = arith.constant 0 : index
    %c0_67 = arith.constant 0 : index
    %217 = vector.load %arg1[%c0_66, %c0_67] : memref<32x128xf32, #tpu.memory_space<vmem>>, vector<32x128xf32>
    %cst_68 = arith.constant dense<0.000000e+00> : vector<2x128xf32>
    %218 = tpu.matmul %209, %217, %cst_68 {dimension_numbers = #tpu.dot_dimension_numbers<[1], [0], [0], [1], [0, 0, 1, 1], [], []>} : vector<2x32xf32>, vector<32x128xf32>, vector<2x128xf32> -> vector<2x128xf32>
    %219 = arith.addf %216, %218 : vector<2x128xf32>
    %220 = vector.extract_strided_slice %219 {offsets = [0, 0], sizes = [2, 32], strides = [1, 1]} : vector<2x128xf32> to vector<2x32xf32>
    %221 = arith.negf %220 : vector<2x32xf32>
    %222 = math.exp %221 : vector<2x32xf32>
    %cst_69 = arith.constant 1.000000e+00 : f32
    %223 = vector.broadcast %cst_69 : f32 to vector<2x32xf32>
    %224 = arith.addf %223, %222 : vector<2x32xf32>
    %225 = arith.divf %223, %224 : vector<2x32xf32>
    %226 = vector.extract_strided_slice %219 {offsets = [0, 32], sizes = [2, 32], strides = [1, 1]} : vector<2x128xf32> to vector<2x32xf32>
    %227 = arith.negf %226 : vector<2x32xf32>
    %228 = math.exp %227 : vector<2x32xf32>
    %cst_70 = arith.constant 1.000000e+00 : f32
    %229 = vector.broadcast %cst_70 : f32 to vector<2x32xf32>
    %230 = arith.addf %229, %228 : vector<2x32xf32>
    %231 = arith.divf %229, %230 : vector<2x32xf32>
    %232 = vector.extract_strided_slice %219 {offsets = [0, 64], sizes = [2, 32], strides = [1, 1]} : vector<2x128xf32> to vector<2x32xf32>
    %233 = math.tanh %232 : vector<2x32xf32>
    %234 = vector.extract_strided_slice %219 {offsets = [0, 96], sizes = [2, 32], strides = [1, 1]} : vector<2x128xf32> to vector<2x32xf32>
    %235 = arith.negf %234 : vector<2x32xf32>
    %236 = math.exp %235 : vector<2x32xf32>
    %cst_71 = arith.constant 1.000000e+00 : f32
    %237 = vector.broadcast %cst_71 : f32 to vector<2x32xf32>
    %238 = arith.addf %237, %236 : vector<2x32xf32>
    %239 = arith.divf %237, %238 : vector<2x32xf32>
    %240 = arith.mulf %231, %207 : vector<2x32xf32>
    %241 = arith.mulf %225, %233 : vector<2x32xf32>
    %242 = arith.addf %240, %241 : vector<2x32xf32>
    %243 = math.tanh %242 : vector<2x32xf32>
    %244 = arith.mulf %239, %243 : vector<2x32xf32>
    %245 = arith.index_cast %c6_i32 : i32 to index
    %c0_72 = arith.constant 0 : index
    %c0_73 = arith.constant 0 : index
    %246 = vector.load %arg4[%245, %c0_72, %c0_73] : memref<8x2x32xf32, #tpu.memory_space<vmem>>, vector<1x2x32xf32>
    %247 = vector.shape_cast %246 : vector<1x2x32xf32> to vector<2x32xf32>
    %248 = vector.shape_cast %244 : vector<2x32xf32> to vector<1x2x32xf32>
    tpu.vector_store %arg4[%245, %c0_72, %c0_73], %248 {strides = array<i32>} : memref<8x2x32xf32, #tpu.memory_space<vmem>>, vector<1x2x32xf32>,
    %c7_i32 = arith.constant 7 : i32
    %249 = arith.index_cast %c7_i32 : i32 to index
    %c0_74 = arith.constant 0 : index
    %c0_75 = arith.constant 0 : index
    %250 = vector.load %arg0[%249, %c0_74, %c0_75] : memref<8x2x128xf32, #tpu.memory_space<vmem>>, vector<1x2x128xf32>
    %251 = vector.shape_cast %250 : vector<1x2x128xf32> to vector<2x128xf32>
    %c0_76 = arith.constant 0 : index
    %c0_77 = arith.constant 0 : index
    %252 = vector.load %arg1[%c0_76, %c0_77] : memref<32x128xf32, #tpu.memory_space<vmem>>, vector<32x128xf32>
    %cst_78 = arith.constant dense<0.000000e+00> : vector<2x128xf32>
    %253 = tpu.matmul %244, %252, %cst_78 {dimension_numbers = #tpu.dot_dimension_numbers<[1], [0], [0], [1], [0, 0, 1, 1], [], []>} : vector<2x32xf32>, vector<32x128xf32>, vector<2x128xf32> -> vector<2x128xf32>
    %254 = arith.addf %251, %253 : vector<2x128xf32>
    %255 = vector.extract_strided_slice %254 {offsets = [0, 0], sizes = [2, 32], strides = [1, 1]} : vector<2x128xf32> to vector<2x32xf32>
    %256 = arith.negf %255 : vector<2x32xf32>
    %257 = math.exp %256 : vector<2x32xf32>
    %cst_79 = arith.constant 1.000000e+00 : f32
    %258 = vector.broadcast %cst_79 : f32 to vector<2x32xf32>
    %259 = arith.addf %258, %257 : vector<2x32xf32>
    %260 = arith.divf %258, %259 : vector<2x32xf32>
    %261 = vector.extract_strided_slice %254 {offsets = [0, 32], sizes = [2, 32], strides = [1, 1]} : vector<2x128xf32> to vector<2x32xf32>
    %262 = arith.negf %261 : vector<2x32xf32>
    %263 = math.exp %262 : vector<2x32xf32>
    %cst_80 = arith.constant 1.000000e+00 : f32
    %264 = vector.broadcast %cst_80 : f32 to vector<2x32xf32>
    %265 = arith.addf %264, %263 : vector<2x32xf32>
    %266 = arith.divf %264, %265 : vector<2x32xf32>
    %267 = vector.extract_strided_slice %254 {offsets = [0, 64], sizes = [2, 32], strides = [1, 1]} : vector<2x128xf32> to vector<2x32xf32>
    %268 = math.tanh %267 : vector<2x32xf32>
    %269 = vector.extract_strided_slice %254 {offsets = [0, 96], sizes = [2, 32], strides = [1, 1]} : vector<2x128xf32> to vector<2x32xf32>
    %270 = arith.negf %269 : vector<2x32xf32>
    %271 = math.exp %270 : vector<2x32xf32>
    %cst_81 = arith.constant 1.000000e+00 : f32
    %272 = vector.broadcast %cst_81 : f32 to vector<2x32xf32>
    %273 = arith.addf %272, %271 : vector<2x32xf32>
    %274 = arith.divf %272, %273 : vector<2x32xf32>
    %275 = arith.mulf %266, %242 : vector<2x32xf32>
    %276 = arith.mulf %260, %268 : vector<2x32xf32>
    %277 = arith.addf %275, %276 : vector<2x32xf32>
    %278 = math.tanh %277 : vector<2x32xf32>
    %279 = arith.mulf %274, %278 : vector<2x32xf32>
    %280 = arith.index_cast %c7_i32 : i32 to index
    %c0_82 = arith.constant 0 : index
    %c0_83 = arith.constant 0 : index
    %281 = vector.load %arg4[%280, %c0_82, %c0_83] : memref<8x2x32xf32, #tpu.memory_space<vmem>>, vector<1x2x32xf32>
    %282 = vector.shape_cast %281 : vector<1x2x32xf32> to vector<2x32xf32>
    %283 = vector.shape_cast %279 : vector<2x32xf32> to vector<1x2x32xf32>
    tpu.vector_store %arg4[%280, %c0_82, %c0_83], %283 {strides = array<i32>} : memref<8x2x32xf32, #tpu.memory_space<vmem>>, vector<1x2x32xf32>,
    %c8_i32 = arith.constant 8 : i32
    %c0_84 = arith.constant 0 : index
    %c0_85 = arith.constant 0 : index
    %c0_86 = arith.constant 0 : index
    %284 = vector.load %arg5[%c0_84, %c0_85, %c0_86] : memref<1x2x32xf32, #tpu.memory_space<vmem>>, vector<1x2x32xf32>
    %285 = vector.shape_cast %284 : vector<1x2x32xf32> to vector<2x32xf32>
    %286 = vector.shape_cast %279 : vector<2x32xf32> to vector<1x2x32xf32>
    tpu.vector_store %arg5[%c0_84, %c0_85, %c0_86], %286 {strides = array<i32>} : memref<1x2x32xf32, #tpu.memory_space<vmem>>, vector<1x2x32xf32>,
    %c0_87 = arith.constant 0 : index
    %c0_88 = arith.constant 0 : index
    %c0_89 = arith.constant 0 : index
    %287 = vector.load %arg6[%c0_87, %c0_88, %c0_89] : memref<1x2x32xf32, #tpu.memory_space<vmem>>, vector<1x2x32xf32>
    %288 = vector.shape_cast %287 : vector<1x2x32xf32> to vector<2x32xf32>
    %289 = vector.shape_cast %277 : vector<2x32xf32> to vector<1x2x32xf32>
    tpu.vector_store %arg6[%c0_87, %c0_88, %c0_89], %289 {strides = array<i32>} : memref<1x2x32xf32, #tpu.memory_space<vmem>>, vector<1x2x32xf32>,
    return
  }
}

</mosaic_0001>

<bundles_post_ra>
// kernel: lstm_model_forward.3
= control target key start
LH: loop header
LB: loop body
LE: loop exit
PB: predicated region body
PF: predicated region fallthrough
CT: control target
= control target key end

     0   :  { %vm28_vm0 = vcmask 261120   ;;  %s243_s0 = inlined_call_operand.vmem [shape: f32[16,32], index: 0, kind: input, shape index: {}]   ;;  %s244_s1 = inlined_call_operand.vmem [shape: f32[32,32], index: 1, kind: input, shape index: {}]   ;;  %s245_s2 = inlined_call_operand.vmem [shape: f32[1,32], index: 2, kind: input, shape index: {}]   ;;  %s246_s3 = inlined_call_operand.hbm [shape: f32[16,32], index: 3, kind: output, shape index: {}]  }
   0x1   :  { %v17_v0 = vld [vmem:[%s244_s1] sm:$0xff]  ;;  %v18_v1 = vld [vmem:[%s244_s1 + $0x8] sm:$0xff]  ;;  %v19_v2 = vld [vmem:[%s244_s1 + $0x10] sm:$0xff] }
   0x2   :  { %v148_v3 = vpack.c.bf16 %v18_v1, %v17_v0  ;;  %v20_v4 = vld [vmem:[%s244_s1 + $0x18] sm:$0xff]  ;;  %v15_v5 = vld [vmem:[%s243_s0] sm:$0xff] }
   0x3   :  { %v152_v6 = vpack.c.bf16 %v20_v4, %v19_v2  ;;  %145 = vmatprep.mubr.msk.f32.mxu0 %vm28_vm0, %v15_v5 }
   0x4   :  { %8 = vsyncpa [#allocation3], 0  ;;  %149 = vmatprep.subr.bf16.mxu0 %v148_v3  ;;  %v16_v7 = vld [vmem:[%s243_s0 + $0x8] sm:$0xff]  ;;  %v128_v8 = vld [vmem:[%s245_s2] ss:$0 sm:$0xff]  ;;  %s183_s25 = smov [#allocation2]  }
   0x5   :  { %151 = vmatpush3.bf16.msra.mxu0 %v148_v3  ;;  %s117_s26 = sshll.u32 %s183_s25, 4  ;;  %s118_s26 = int_to_ptr.vmem [resolvable:$true] %s117_s26 }
   0x6   :  { %153 = vmatprep.subr.bf16.mxu0 %v152_v6  ;;  %s159_s27 = scalar_lea.vmem %s118_s26, 256  ;;  %p164_p1 = scmp.lt.s32.totalorder %s118_s26, %s118_s26 }
   0x7   :  { %p160_p0 = scmp.ne.s32.totalorder %s118_s26, %s159_s27  ;;  %p165_p2 = scmp.lt.s32.totalorder %s159_s27, %s159_s27 }
   0x9   :  { %155 = vmatpush3.bf16.msra.mxu0 %v152_v6  ;;  %p166_p3 = por %p165_p2, %p164_p1 }
   0xb   :  { %p167_p4 = pnand %p166_p3, %p160_p0 }
   0xc   :  { %146 = vmatmul.mubr.msk.f32.vlgmr.msra.gmra.mrb[0].mxu0 %vm28_vm0, %v16_v7 }
  0xdf   :  { %v147_v9 = vpop.f32.mrb[0].mxu0 }
  0xe0   :  { %v107_v10 = vadd.f32 %v147_v9, %v128_v8  ;;  %v101_v11 = vpop.f32.mrb[1].mxu0 }
  0xe1   :  { %v102_v12 = vadd.f32 %v128_v8, %v101_v11 }
  0xe2   :  { %111 = vst.msk [vmem:[#allocation2 + $0x8] sm:$0xff] %vm28_vm0, %v107_v10 }
  0xe3   :  { %110 = vst.msk [vmem:[#allocation2] sm:$0xff] %vm28_vm0, %v102_v12 }
  0xe4   :  { %170 = shalt.err (!%p167_p4)
}
  0xe5   :  { %s171_s28 = scalar_lea.hbm %s246_s3, 256 }
  0xe6   :  { %p172_p5 = scmp.ne.s32.totalorder %s246_s3, %s171_s28  ;;  %p175_p6 = scmp.lt.u32.totalorder %s171_s28, %s246_s3 }
  0xe8   :  { %p177_p7 = pnand %p175_p6, %p172_p5 }
  0xea   :  { %180 = shalt.err (!%p177_p7)
}
  0xeb   :  { %s184_s6 = smov 128   ;;  %s185_s7 = smov 8  }
  0xec   :  { %123 = dma.vmem_to_hbm [thread:$0]  %s118_s26, 256, %s246_s3, [#allocation3], %s184_s6, %s184_s6, %s185_s7  }
  0xed   :  { %181 = dma.done.wait [#allocation3], 256  }
  0xee   :  { %182 = vsyncadd [#allocation3], 4294967040 }
  0xef   :  { %127 = vsyncpa [#allocation3], 1 }

// kernel: lstm_model_forward.2
= control target key start
LH: loop header
LB: loop body
LE: loop exit
PB: predicated region body
PF: predicated region fallthrough
CT: control target
= control target key end

     0   :  { %12 = vsyncpa [#allocation3], 0  ;;  %v1265_v3 = vmov 0.0|0.0   ;;  %vm1266_vm0 = vmmov 0   ;;  %v1267_v6 = vmov 0.0   ;;  %s1501_s0 = inlined_call_operand.vmem [shape: f32[8,2,128], index: 0, kind: input, shape index: {}]   ;;  %s1502_s1 = inlined_call_operand.vmem [shape: f32[32,128], index: 1, kind: input, shape index: {}]   ;;  %s1503_s2 = inlined_call_operand.vmem [shape: f32[1,2,32], index: 2, kind: input, shape index: {}]   ;;  %s1504_s3 = inlined_call_operand.vmem [shape: f32[1,2,32], index: 3, kind: input, shape index: {}]   ;;  %s1505_s4 = inlined_call_operand.vmem [shape: f32[8,2,32], index: 4, kind: output, shape index: {0}]   ;;  %s1506_s5 = inlined_call_operand.hbm [shape: f32[1,2,32], index: 5, kind: output, shape index: {1}]   ;;  %s1507_s6 = inlined_call_operand.hbm [shape: f32[1,2,32], index: 6, kind: output, shape index: {2}]  }
   0x1   :  { %v25_v0 = vld [vmem:[%s1502_s1] sm:$0xff]  ;;  %v26_v1 = vld [vmem:[%s1502_s1 + $0x8] sm:$0xff]  ;;  %v27_v2 = vld [vmem:[%s1502_s1 + $0x10] sm:$0xff]  ;;  %1097 = vmatprep.subr.bf16.mxu0 %v1265_v3  ;;  %1017 = vmatprep.mubr.msk.f32.mxu0 %vm1266_vm0, %v1267_v6 }
   0x2   :  { %v1318_v4 = vpack.c.bf16 %v26_v1, %v25_v0  ;;  %v28_v5 = vld [vmem:[%s1502_s1 + $0x18] sm:$0xff]  ;;  %1103 = vmatprep.subr.bf16.mxu1 %v1265_v3  ;;  %1028 = vmatprep.mubr.msk.f32.mxu1 %vm1266_vm0, %v1267_v6 }
   0x3   :  { %13 = vsyncpa [#allocation5], 0  ;;  %v1329_v7 = vpack.c.bf16 %v28_v5, %v27_v2  ;;  %v22_v8 = vld [vmem:[%s1503_s2] sm:$0x3]  ;;  %vm29_vm1 = vcmask 261120   ;;  %s1268_s7 = smov 64  }
   0x4   :  { %1099 = vmatpush3.bf16.msra.mxu0 %v1318_v4  ;;  %1105 = vmatpush3.bf16.msra.mxu1 %v1318_v4  ;;  %v24_v9 = vld [vmem:[%s1501_s0] sm:$0x3]  ;;  %s1269_s10 = smov 32   ;;  %vm136_vm2 = vcmask 254976   ;;  %v941_v29 = vld [vmem:[%s1501_s0 + $0x2] sm:$0x3] }
   0x5   :  { %1100 = vmatprep.subr.bf16.mxu0 %v1265_v3  ;;  %1106 = vmatprep.subr.bf16.mxu1 %v1265_v3  ;;  %v23_v14 = vld [vmem:[%s1504_s3] sm:$0x3]  ;;  %v945_v47 = vld [vmem:[%s1501_s0 + $0x4] sm:$0x3]  ;;  %v949_v1 = vld [vmem:[%s1501_s0 + $0x6] sm:$0x3] }
   0x6   :  { %s1271_s13 = smov [#allocation4]  }
   0x7   :  { %s925_s14 = sshll.u32 %s1271_s13, 4  ;;  %s926_s14 = int_to_ptr.vmem [resolvable:$true] %s925_s14 }
   0x8   :  { %1102 = vmatpush3.bf16.msra.mxu0 %v1329_v7  ;;  %1108 = vmatpush3.bf16.msra.mxu1 %v1329_v7  ;;  %s1217_s15 = scalar_lea.vmem %s926_s14, 32  ;;  %p1222_p1 = scmp.lt.s32.totalorder %s926_s14, %s926_s14 }
   0x9   :  { %1109 = vmatprep.subr.bf16.mxu0 %v1265_v3  ;;  %1115 = vmatprep.subr.bf16.mxu1 %v1265_v3  ;;  %p1218_p0 = scmp.ne.s32.totalorder %s926_s14, %s1217_s15  ;;  %p1223_p2 = scmp.lt.s32.totalorder %s1217_s15, %s1217_s15 }
   0xb   :  { %1018 = vmatmul.mubr.msk.f32.vlgmr.msra.gmra.mrb[0].mxu0 %vm29_vm1, %v22_v8  ;;  %p1224_p3 = por %p1223_p2, %p1222_p1 }
   0xc   :  { %1111 = vmatpush3.bf16.msra.mxu0 %v1318_v4  ;;  %1039 = vmatprep.mubr.msk.f32.mxu0 %vm1266_vm0, %v1267_v6 }
   0xd   :  { %1112 = vmatprep.subr.bf16.mxu0 %v1265_v3  ;;  %p1225_p4 = pnand %p1224_p3, %p1218_p0 }
  0x10   :  { %1114 = vmatpush3.bf16.msra.mxu0 %v1329_v7 }
  0x11   :  { %1121 = vmatprep.subr.bf16.mxu0 %v1265_v3 }
  0xde   :  { %v99_v10 = vpop.f32.mrb[0].mxu0 }
  0xdf   :  { %v103_v11 = vadd.f32 %v99_v10, %v24_v9  ;;  %v1019_v12 = vpop.f32.mrb[1].mxu0 }
  0xe1   :  { %1153 = vtanh.f32 %v103_v11  ;;  %v940_v15 = vmul.f32 -1.442695, %v103_v11 }
  0xe3   :  { %1155 = vpow2.f32 %v940_v15 }
  0xeb   :  { %v1154_v13 = vpop.eup %1153 }
  0xec   :  { %117 = vrot.lane.b32.xlu0 %v1154_v13, %s1268_s7 }
  0xed   :  { %v1156_v16 = vpop.eup %1155 }
  0xee   :  { %v107_v17 = vadd.f32 1.0, %v1156_v16 }
  0xf0   :  { %112 = vrot.lane.b32.xlu0 %v23_v14, %s1269_s10  ;;  %1157 = vrcp.f32 %v107_v17 }
  0xfa   :  { %v1158_v18 = vpop.eup %1157 }
 0x15e   :  { %v118_v19 = vpop.permute.xlu0 %117 }
 0x15f   :  { %v120_v20 = vmul.f32 %v1158_v18, %v118_v19 }
 0x161   :  { %122 = vrot.lane.b32.xlu1 %v120_v20, %s1269_s10 }
 0x162   :  { %v113_v21 = vpop.permute.xlu0 %112 }
 0x163   :  { %v115_v22 = vmul.f32 %v1158_v18, %v113_v21 }
 0x1d3   :  { %v123_v23 = vpop.permute.xlu1 %122 }
 0x1d4   :  { %v125_v24 = vadd.f32 %v123_v23, %v115_v22  ;;  %v953_v23 = vld [vmem:[%s1501_s0 + $0x8] sm:$0x3] }
 0x1d6   :  { %1159 = vtanh.f32 %v125_v24 }
 0x1e0   :  { %v1160_v25 = vpop.eup %1159 }
 0x1e1   :  { %128 = vrot.lane.b32.xlu1 %v1160_v25, %s1268_s7 }
 0x253   :  { %v129_v26 = vpop.permute.xlu1 %128 }
 0x254   :  { %v131_v27 = vmul.f32 %v1158_v18, %v129_v26 }
 0x256   :  { %133 = vrot.lane.b32.xlu0 %v131_v27, %s1269_s10 }
 0x2c8   :  { %v134_v28 = vpop.permute.xlu0 %133 }
 0x2c9   :  { %137 = vst.msk [vmem:[%s1505_s4] sm:$0x3] %vm136_vm2, %v134_v28  ;;  %1029 = vmatmul.mubr.msk.f32.vlgmr.msra.gmra.mrb[0].mxu1 %vm29_vm1, %v134_v28 }
 0x2ca   :  { %1117 = vmatpush3.bf16.msra.mxu1 %v1318_v4  ;;  %1050 = vmatprep.mubr.msk.f32.mxu1 %vm1266_vm0, %v1267_v6 }
 0x2cb   :  { %1118 = vmatprep.subr.bf16.mxu1 %v1265_v3 }
 0x2ce   :  { %1120 = vmatpush3.bf16.msra.mxu1 %v1329_v7 }
 0x2cf   :  { %1127 = vmatprep.subr.bf16.mxu1 %v1265_v3 }
 0x39c   :  { %v212_v30 = vpop.f32.mrb[0].mxu1 }
 0x39d   :  { %v216_v31 = vadd.f32 %v941_v29, %v212_v30  ;;  %v1030_v32 = vpop.f32.mrb[1].mxu1 }
 0x39f   :  { %1161 = vtanh.f32 %v216_v31  ;;  %v943_v34 = vmul.f32 -1.442695, %v216_v31 }
 0x3a1   :  { %1163 = vpow2.f32 %v943_v34 }
 0x3a9   :  { %v1162_v33 = vpop.eup %1161 }
 0x3aa   :  { %226 = vrot.lane.b32.xlu1 %v1162_v33, %s1268_s7 }
 0x3ab   :  { %v1164_v35 = vpop.eup %1163 }
 0x3ac   :  { %v220_v36 = vadd.f32 1.0, %v1164_v35 }
 0x3ae   :  { %1165 = vrcp.f32 %v220_v36 }
 0x3b8   :  { %v1166_v37 = vpop.eup %1165 }
 0x3b9   :  { %v224_v40 = vmul.f32 %v1166_v37, %v125_v24 }
 0x41c   :  { %v227_v38 = vpop.permute.xlu1 %226 }
 0x41d   :  { %v229_v39 = vmul.f32 %v1166_v37, %v227_v38 }
 0x41f   :  { %231 = vrot.lane.b32.xlu0 %v229_v39, %s1269_s10 }
 0x491   :  { %v232_v41 = vpop.permute.xlu0 %231 }
 0x492   :  { %v234_v42 = vadd.f32 %v232_v41, %v224_v40  ;;  %v957_v41 = vld [vmem:[%s1501_s0 + $0xa] sm:$0x3] }
 0x494   :  { %1167 = vtanh.f32 %v234_v42 }
 0x49e   :  { %v1168_v43 = vpop.eup %1167 }
 0x49f   :  { %237 = vrot.lane.b32.xlu1 %v1168_v43, %s1268_s7 }
 0x511   :  { %v238_v44 = vpop.permute.xlu1 %237 }
 0x512   :  { %v240_v45 = vmul.f32 %v1166_v37, %v238_v44 }
 0x514   :  { %242 = vrot.lane.b32.xlu0 %v240_v45, %s1269_s10 }
 0x586   :  { %v243_v46 = vpop.permute.xlu0 %242 }
 0x587   :  { %944 = vst.msk [vmem:[%s1505_s4 + $0x2] sm:$0x3] %vm136_vm2, %v243_v46  ;;  %1040 = vmatmul.mubr.msk.f32.vlgmr.msra.gmra.mrb[2].mxu0 %vm29_vm1, %v243_v46 }
 0x588   :  { %1123 = vmatpush3.bf16.msra.mxu0 %v1318_v4  ;;  %1061 = vmatprep.mubr.msk.f32.mxu0 %vm1266_vm0, %v1267_v6 }
 0x589   :  { %1124 = vmatprep.subr.bf16.mxu0 %v1265_v3 }
 0x58c   :  { %1126 = vmatpush3.bf16.msra.mxu0 %v1329_v7 }
 0x58d   :  { %1133 = vmatprep.subr.bf16.mxu0 %v1265_v3 }
 0x65a   :  { %v321_v48 = vpop.f32.mrb[2].mxu0 }
 0x65b   :  { %v325_v49 = vadd.f32 %v945_v47, %v321_v48  ;;  %v1041_v50 = vpop.f32.mrb[3].mxu0 }
 0x65d   :  { %1169 = vtanh.f32 %v325_v49  ;;  %v947_v52 = vmul.f32 -1.442695, %v325_v49 }
 0x65f   :  { %1171 = vpow2.f32 %v947_v52 }
 0x667   :  { %v1170_v51 = vpop.eup %1169 }
 0x668   :  { %335 = vrot.lane.b32.xlu1 %v1170_v51, %s1268_s7 }
 0x669   :  { %v1172_v53 = vpop.eup %1171 }
 0x66a   :  { %v329_v54 = vadd.f32 1.0, %v1172_v53 }
 0x66c   :  { %1173 = vrcp.f32 %v329_v54 }
 0x676   :  { %v1174_v55 = vpop.eup %1173 }
 0x677   :  { %v333_v58 = vmul.f32 %v1174_v55, %v234_v42 }
 0x6da   :  { %v336_v56 = vpop.permute.xlu1 %335 }
 0x6db   :  { %v338_v57 = vmul.f32 %v1174_v55, %v336_v56 }
 0x6dd   :  { %340 = vrot.lane.b32.xlu0 %v338_v57, %s1269_s10 }
 0x74f   :  { %v341_v59 = vpop.permute.xlu0 %340 }
 0x750   :  { %v343_v60 = vadd.f32 %v341_v59, %v333_v58 }
 0x752   :  { %1175 = vtanh.f32 %v343_v60 }
 0x75c   :  { %v1176_v61 = vpop.eup %1175 }
 0x75d   :  { %346 = vrot.lane.b32.xlu1 %v1176_v61, %s1268_s7 }
 0x7cf   :  { %v347_v62 = vpop.permute.xlu1 %346 }
 0x7d0   :  { %v349_v63 = vmul.f32 %v1174_v55, %v347_v62  ;;  %v961_v55 = vld [vmem:[%s1501_s0 + $0xc] sm:$0x3] }
 0x7d2   :  { %351 = vrot.lane.b32.xlu0 %v349_v63, %s1269_s10 }
 0x844   :  { %v352_v0 = vpop.permute.xlu0 %351 }
 0x845   :  { %948 = vst.msk [vmem:[%s1505_s4 + $0x4] sm:$0x3] %vm136_vm2, %v352_v0  ;;  %1051 = vmatmul.mubr.msk.f32.vlgmr.msra.gmra.mrb[2].mxu1 %vm29_vm1, %v352_v0 }
 0x846   :  { %1129 = vmatpush3.bf16.msra.mxu1 %v1318_v4  ;;  %1072 = vmatprep.mubr.msk.f32.mxu1 %vm1266_vm0, %v1267_v6 }
 0x847   :  { %1130 = vmatprep.subr.bf16.mxu1 %v1265_v3 }
 0x84a   :  { %1132 = vmatpush3.bf16.msra.mxu1 %v1329_v7 }
 0x84b   :  { %1139 = vmatprep.subr.bf16.mxu1 %v1265_v3 }
 0x918   :  { %v430_v2 = vpop.f32.mrb[2].mxu1 }
 0x919   :  { %v434_v5 = vadd.f32 %v949_v1, %v430_v2  ;;  %v1052_v8 = vpop.f32.mrb[3].mxu1 }
 0x91b   :  { %1177 = vtanh.f32 %v434_v5  ;;  %v951_v10 = vmul.f32 -1.442695, %v434_v5 }
 0x91d   :  { %1179 = vpow2.f32 %v951_v10 }
 0x925   :  { %v1178_v9 = vpop.eup %1177 }
 0x926   :  { %444 = vrot.lane.b32.xlu1 %v1178_v9, %s1268_s7 }
 0x927   :  { %v1180_v11 = vpop.eup %1179 }
 0x928   :  { %v438_v12 = vadd.f32 1.0, %v1180_v11 }
 0x92a   :  { %1181 = vrcp.f32 %v438_v12 }
 0x934   :  { %v1182_v13 = vpop.eup %1181 }
 0x935   :  { %v442_v16 = vmul.f32 %v1182_v13, %v343_v60 }
 0x998   :  { %v445_v14 = vpop.permute.xlu1 %444 }
 0x999   :  { %v447_v15 = vmul.f32 %v1182_v13, %v445_v14 }
 0x99b   :  { %449 = vrot.lane.b32.xlu0 %v447_v15, %s1269_s10 }
 0xa0d   :  { %v450_v17 = vpop.permute.xlu0 %449 }
 0xa0e   :  { %v452_v18 = vadd.f32 %v450_v17, %v442_v16 }
 0xa10   :  { %1183 = vtanh.f32 %v452_v18 }
 0xa1a   :  { %v1184_v19 = vpop.eup %1183 }
 0xa1b   :  { %455 = vrot.lane.b32.xlu1 %v1184_v19, %s1268_s7 }
 0xa8d   :  { %v456_v20 = vpop.permute.xlu1 %455 }
 0xa8e   :  { %v458_v21 = vmul.f32 %v1182_v13, %v456_v20  ;;  %v965_v13 = vld [vmem:[%s1501_s0 + $0xe] sm:$0x3]  ;;  %s1270_s0 = smov 96  }
 0xa90   :  { %460 = vrot.lane.b32.xlu0 %v458_v21, %s1269_s10 }
 0xb02   :  { %v461_v22 = vpop.permute.xlu0 %460 }
 0xb03   :  { %952 = vst.msk [vmem:[%s1505_s4 + $0x6] sm:$0x3] %vm136_vm2, %v461_v22  ;;  %1062 = vmatmul.mubr.msk.f32.vlgmr.msra.gmra.mrb[4].mxu0 %vm29_vm1, %v461_v22 }
 0xb04   :  { %1135 = vmatpush3.bf16.msra.mxu0 %v1318_v4  ;;  %1083 = vmatprep.mubr.msk.f32.mxu0 %vm1266_vm0, %v1267_v6 }
 0xb05   :  { %1136 = vmatprep.subr.bf16.mxu0 %v1265_v3 }
 0xb08   :  { %1138 = vmatpush3.bf16.msra.mxu0 %v1329_v7 }
 0xbd6   :  { %v539_v24 = vpop.f32.mrb[4].mxu0 }
 0xbd7   :  { %v543_v25 = vadd.f32 %v953_v23, %v539_v24  ;;  %v1063_v26 = vpop.f32.mrb[5].mxu0 }
 0xbd9   :  { %1185 = vtanh.f32 %v543_v25  ;;  %v955_v28 = vmul.f32 -1.442695, %v543_v25 }
 0xbdb   :  { %1187 = vpow2.f32 %v955_v28 }
 0xbe3   :  { %v1186_v27 = vpop.eup %1185 }
 0xbe4   :  { %553 = vrot.lane.b32.xlu1 %v1186_v27, %s1268_s7 }
 0xbe5   :  { %v1188_v29 = vpop.eup %1187 }
 0xbe6   :  { %v547_v30 = vadd.f32 1.0, %v1188_v29 }
 0xbe8   :  { %1189 = vrcp.f32 %v547_v30 }
 0xbf2   :  { %v1190_v31 = vpop.eup %1189 }
 0xbf3   :  { %v551_v34 = vmul.f32 %v1190_v31, %v452_v18 }
 0xc56   :  { %v554_v32 = vpop.permute.xlu1 %553 }
 0xc57   :  { %v556_v33 = vmul.f32 %v1190_v31, %v554_v32 }
 0xc59   :  { %558 = vrot.lane.b32.xlu0 %v556_v33, %s1269_s10 }
 0xccb   :  { %v559_v35 = vpop.permute.xlu0 %558 }
 0xccc   :  { %v561_v36 = vadd.f32 %v559_v35, %v551_v34 }
 0xcce   :  { %1191 = vtanh.f32 %v561_v36 }
 0xcd8   :  { %v1192_v37 = vpop.eup %1191 }
 0xcd9   :  { %564 = vrot.lane.b32.xlu1 %v1192_v37, %s1268_s7 }
 0xd4b   :  { %v565_v38 = vpop.permute.xlu1 %564 }
 0xd4c   :  { %v567_v39 = vmul.f32 %v1190_v31, %v565_v38 }
 0xd4e   :  { %569 = vrot.lane.b32.xlu0 %v567_v39, %s1269_s10 }
 0xdc0   :  { %v570_v40 = vpop.permute.xlu0 %569 }
 0xdc1   :  { %956 = vst.msk [vmem:[%s1505_s4 + $0x8] sm:$0x3] %vm136_vm2, %v570_v40  ;;  %1073 = vmatmul.mubr.msk.f32.vlgmr.msra.gmra.mrb[4].mxu1 %vm29_vm1, %v570_v40 }
 0xdc2   :  { %1141 = vmatpush3.bf16.msra.mxu1 %v1318_v4  ;;  %1094 = vmatprep.mubr.msk.f32.mxu1 %vm1266_vm0, %v1267_v6 }
 0xdc3   :  { %1142 = vmatprep.subr.bf16.mxu1 %v1265_v3 }
 0xdc6   :  { %1144 = vmatpush3.bf16.msra.mxu1 %v1329_v7 }
 0xe94   :  { %v648_v42 = vpop.f32.mrb[4].mxu1 }
 0xe95   :  { %v652_v43 = vadd.f32 %v957_v41, %v648_v42  ;;  %v1074_v44 = vpop.f32.mrb[5].mxu1 }
 0xe97   :  { %1193 = vtanh.f32 %v652_v43  ;;  %v959_v46 = vmul.f32 -1.442695, %v652_v43 }
 0xe99   :  { %1195 = vpow2.f32 %v959_v46 }
 0xea1   :  { %v1194_v45 = vpop.eup %1193 }
 0xea2   :  { %662 = vrot.lane.b32.xlu1 %v1194_v45, %s1268_s7 }
 0xea3   :  { %v1196_v4 = vpop.eup %1195 }
 0xea4   :  { %v656_v47 = vadd.f32 1.0, %v1196_v4 }
 0xea6   :  { %1197 = vrcp.f32 %v656_v47 }
 0xeb0   :  { %v1198_v6 = vpop.eup %1197 }
 0xeb1   :  { %v660_v7 = vmul.f32 %v1198_v6, %v561_v36 }
 0xf14   :  { %v663_v3 = vpop.permute.xlu1 %662 }
 0xf15   :  { %v665_v48 = vmul.f32 %v1198_v6, %v663_v3 }
 0xf17   :  { %667 = vrot.lane.b32.xlu0 %v665_v48, %s1269_s10 }
 0xf89   :  { %v668_v49 = vpop.permute.xlu0 %667 }
 0xf8a   :  { %v670_v50 = vadd.f32 %v668_v49, %v660_v7 }
 0xf8c   :  { %1199 = vtanh.f32 %v670_v50 }
 0xf96   :  { %v1200_v51 = vpop.eup %1199 }
 0xf97   :  { %673 = vrot.lane.b32.xlu1 %v1200_v51, %s1268_s7 }
0x1009   :  { %v674_v52 = vpop.permute.xlu1 %673 }
0x100a   :  { %v676_v53 = vmul.f32 %v1198_v6, %v674_v52 }
0x100c   :  { %678 = vrot.lane.b32.xlu0 %v676_v53, %s1269_s10 }
0x107e   :  { %v679_v54 = vpop.permute.xlu0 %678 }
0x107f   :  { %960 = vst.msk [vmem:[%s1505_s4 + $0xa] sm:$0x3] %vm136_vm2, %v679_v54  ;;  %1084 = vmatmul.mubr.msk.f32.vlgmr.msra.gmra.mrb[6].mxu0 %vm29_vm1, %v679_v54 }
0x1152   :  { %v757_v56 = vpop.f32.mrb[6].mxu0 }
0x1153   :  { %v761_v57 = vadd.f32 %v961_v55, %v757_v56  ;;  %v1085_v58 = vpop.f32.mrb[7].mxu0 }
0x1155   :  { %1201 = vtanh.f32 %v761_v57  ;;  %v963_v60 = vmul.f32 -1.442695, %v761_v57 }
0x1157   :  { %1203 = vpow2.f32 %v963_v60 }
0x115f   :  { %v1202_v59 = vpop.eup %1201 }
0x1160   :  { %771 = vrot.lane.b32.xlu1 %v1202_v59, %s1268_s7 }
0x1161   :  { %v1204_v61 = vpop.eup %1203 }
0x1162   :  { %v765_v62 = vadd.f32 1.0, %v1204_v61 }
0x1164   :  { %1205 = vrcp.f32 %v765_v62 }
0x116e   :  { %v1206_v63 = vpop.eup %1205 }
0x116f   :  { %v769_v2 = vmul.f32 %v1206_v63, %v670_v50 }
0x11d2   :  { %v772_v0 = vpop.permute.xlu1 %771 }
0x11d3   :  { %v774_v1 = vmul.f32 %v1206_v63, %v772_v0 }
0x11d5   :  { %776 = vrot.lane.b32.xlu0 %v774_v1, %s1269_s10 }
0x1247   :  { %v777_v5 = vpop.permute.xlu0 %776 }
0x1248   :  { %v779_v8 = vadd.f32 %v777_v5, %v769_v2 }
0x124a   :  { %1207 = vtanh.f32 %v779_v8 }
0x1254   :  { %v1208_v9 = vpop.eup %1207 }
0x1255   :  { %782 = vrot.lane.b32.xlu1 %v1208_v9, %s1268_s7 }
0x12c7   :  { %v783_v10 = vpop.permute.xlu1 %782 }
0x12c8   :  { %v785_v11 = vmul.f32 %v1206_v63, %v783_v10 }
0x12ca   :  { %787 = vrot.lane.b32.xlu0 %v785_v11, %s1269_s10 }
0x133c   :  { %v788_v12 = vpop.permute.xlu0 %787 }
0x133d   :  { %964 = vst.msk [vmem:[%s1505_s4 + $0xc] sm:$0x3] %vm136_vm2, %v788_v12  ;;  %1095 = vmatmul.mubr.msk.f32.vlgmr.msra.gmra.mrb[6].mxu1 %vm29_vm1, %v788_v12 }
0x1410   :  { %v866_v14 = vpop.f32.mrb[6].mxu1 }
0x1411   :  { %v870_v15 = vadd.f32 %v965_v13, %v866_v14  ;;  %v1096_v16 = vpop.f32.mrb[7].mxu1 }
0x1413   :  { %1209 = vtanh.f32 %v870_v15  ;;  %v967_v18 = vmul.f32 -1.442695, %v870_v15 }
0x1415   :  { %1211 = vpow2.f32 %v967_v18 }
0x141d   :  { %v1210_v17 = vpop.eup %1209 }
0x141e   :  { %880 = vrot.lane.b32.xlu1 %v1210_v17, %s1268_s7 }
0x141f   :  { %v1212_v19 = vpop.eup %1211 }
0x1420   :  { %v874_v20 = vadd.f32 1.0, %v1212_v19 }
0x1422   :  { %1213 = vrcp.f32 %v874_v20 }
0x142c   :  { %v1214_v21 = vpop.eup %1213 }
0x142d   :  { %v878_v24 = vmul.f32 %v1214_v21, %v779_v8 }
0x1490   :  { %v881_v22 = vpop.permute.xlu1 %880 }
0x1491   :  { %v883_v23 = vmul.f32 %v1214_v21, %v881_v22 }
0x1493   :  { %885 = vrot.lane.b32.xlu0 %v883_v23, %s1269_s10 }
0x1505   :  { %v886_v25 = vpop.permute.xlu0 %885 }
0x1506   :  { %v888_v26 = vadd.f32 %v886_v25, %v878_v24 }
0x1508   :  { %1215 = vtanh.f32 %v888_v26 }
0x1512   :  { %v1216_v27 = vpop.eup %1215 }
0x1513   :  { %891 = vrot.lane.b32.xlu1 %v1216_v27, %s1268_s7 }
0x1517   :  { %903 = vrot.lane.b32.xlu1 %v888_v26, %s1270_s0 }
0x1585   :  { %v892_v28 = vpop.permute.xlu1 %891 }
0x1586   :  { %v894_v29 = vmul.f32 %v1214_v21, %v892_v28 }
0x1588   :  { %896 = vrot.lane.b32.xlu0 %v894_v29, %s1269_s10 }
0x1589   :  { %v904_v30 = vpop.permute.xlu1 %903 }
0x158a   :  { %906 = vst.msk [vmem:[#allocation4] sm:$0x3] %vm136_vm2, %v904_v30 }
0x158b   :  { %1228 = shalt.err (!%p1225_p4)
}
0x158c   :  { %s1229_s17 = scalar_lea.hbm %s1507_s6, 32 }
0x158d   :  { %p1230_p5 = scmp.ne.s32.totalorder %s1507_s6, %s1229_s17  ;;  %p1233_p6 = scmp.lt.u32.totalorder %s1229_s17, %s1507_s6 }
0x158f   :  { %p1235_p7 = pnand %p1233_p6, %p1230_p5 }
0x1591   :  { %1238 = shalt.err (!%p1235_p7)
}
0x1592   :  { %928 = dma.vmem_to_hbm [thread:$0]  %s926_s14, 32, %s1507_s6, [#allocation5]  }
0x1593   :  { %s1272_s23 = smov [#allocation2]  }
0x1594   :  { %s915_s24 = sshll.u32 %s1272_s23, 4  ;;  %s916_s24 = int_to_ptr.vmem [resolvable:$true] %s915_s24 }
0x1595   :  { %s1239_s27 = scalar_lea.vmem %s916_s24, 32  ;;  %p1244_p9 = scmp.lt.s32.totalorder %s916_s24, %s916_s24 }
0x1596   :  { %p1240_p8 = scmp.ne.s32.totalorder %s916_s24, %s1239_s27  ;;  %p1245_p10 = scmp.lt.s32.totalorder %s1239_s27, %s1239_s27 }
0x1598   :  { %p1246_p11 = por %p1245_p10, %p1244_p9 }
0x159a   :  { %p1247_p12 = pnand %p1246_p11, %p1240_p8 }
0x15fa   :  { %v897_v31 = vpop.permute.xlu0 %896 }
0x15fb   :  { %968 = vst.msk [vmem:[%s1505_s4 + $0xe] sm:$0x3] %vm136_vm2, %v897_v31  ;;  %901 = vst.msk [vmem:[#allocation2] sm:$0x3] %vm136_vm2, %v897_v31 }
0x15fc   :  { %1250 = shalt.err (!%p1247_p12)
}
0x15fd   :  { %s1251_s1 = scalar_lea.hbm %s1506_s5, 32 }
0x15fe   :  { %p1252_p13 = scmp.ne.s32.totalorder %s1506_s5, %s1251_s1  ;;  %p1255_p0 = scmp.lt.u32.totalorder %s1251_s1, %s1506_s5 }
0x1600   :  { %p1257_p1 = pnand %p1255_p0, %p1252_p13 }
0x1602   :  { %1260 = shalt.err (!%p1257_p1)
}
0x1603   :  { %918 = dma.vmem_to_hbm [thread:$0]  %s916_s24, 32, %s1506_s5, [#allocation3]  }
0x1604   :  { %1261 = dma.done.wait [#allocation3], 32  }
0x1605   :  { %1262 = vsyncadd [#allocation3], 4294967264 }
0x1606   :  { %1263 = dma.done.wait [#allocation5], 32  }
0x1607   :  { %1264 = vsyncadd [#allocation5], 4294967264 }
0x1608   :  { %937 = vsyncpa [#allocation3], 1 }
0x1609   :  { %938 = vsyncpa [#allocation5], 1 }

</bundles_post_ra>
